<compile_context>
chip_gen: v7x
topology: tpu7x:2x2x1
jax: 0.10.0
libtpu: 0.0.40
codegen_flags: <defaults>
</compile_context>

<pallas_src>
import jax
import jax.numpy as jnp
from jax.experimental import pallas as pl
from jax.experimental.pallas import tpu as pltpu


_TILE_ROWS = 512   # >=512-wide tiles reach ~85% of HBM roofline (measured, v6e)
_TILE_COLS = 512   # lane-dense: multiple of 128 -> unmasked vector stores


def _identity_kernel(x_ref, o_ref):
    # Pure pass-through: G.forward performs no computation.
    o_ref[...] = x_ref[...]


def _lane_dense_shape(total: int) -> tuple[int, int]:
    """Pick a 2-D slab with a lane-dense (multiple-of-128) last dim."""
    if total % 128 != 0:
        # Irregular size: single row; block == full array so no (8,128) rule.
        return (1, total)
    cols = 128
    # Widen lanes while rows stay a multiple of 8 (full (8,128) vregs).
    while (cols * 2 <= 4096
           and total % (cols * 2) == 0
           and (total // (cols * 2)) % 8 == 0):
        cols *= 2
    return (total // cols, cols)


def _full_block_copy(x2d: jax.Array) -> jax.Array:
    """Tiny inputs: one full-array VMEM block; grid overhead would dominate."""
    return pl.pallas_call(
        _identity_kernel,
        out_shape=jax.ShapeDtypeStruct(x2d.shape, x2d.dtype),
        in_specs=[pl.BlockSpec(x2d.shape, lambda: (0, 0))],
        out_specs=pl.BlockSpec(x2d.shape, lambda: (0, 0)),
        input_output_aliases={0: 0},   # alias: drop the extra HBM write stream
    )(x2d)


def _tiled_copy(x2d: jax.Array) -> jax.Array:
    """Large inputs: pipelined lane-dense tiles; row axis sharded across TCs."""
    rows, cols = x2d.shape
    assert cols == _TILE_COLS and rows % _TILE_ROWS == 0
    return pl.pallas_call(
        _identity_kernel,
        out_shape=jax.ShapeDtypeStruct(x2d.shape, x2d.dtype),
        grid_spec=pltpu.PrefetchScalarGridSpec(
            num_scalar_prefetch=0,
            grid=(rows // _TILE_ROWS,),
            in_specs=[pl.BlockSpec((_TILE_ROWS, _TILE_COLS), lambda i: (i, 0))],
            out_specs=pl.BlockSpec((_TILE_ROWS, _TILE_COLS), lambda i: (i, 0)),
        ),
        input_output_aliases={0: 0},   # in-place pass-through
        compiler_params=pltpu.CompilerParams(
            dimension_semantics=("parallel",),   # megacore sharding on v7x
            vmem_limit_bytes=32 << 20,           # safe under v7x's 64 MiB VMEM
        ),
    )(x2d)


def _pallas_identity(x: jax.Array) -> jax.Array:
    """Identity (pass-through) of `x` via a Pallas TPU kernel."""
    flat = x.reshape(-1)
    total = flat.size
    tile_elems = _TILE_ROWS * _TILE_COLS
    if total % tile_elems == 0 and total >= 2 * tile_elems:
        y = _tiled_copy(flat.reshape(total // _TILE_COLS, _TILE_COLS))
    else:
        y = _full_block_copy(flat.reshape(_lane_dense_shape(total)))
    return y.reshape(x.shape)


def g_forward(x: jax.Array, *, debug_run_kernel: bool = False):
    """JAX/Pallas equivalent of G.forward(x).

    The PyTorch forward body is `pass`: no parameters, no computation, returns
    None.  The fastest correct implementation therefore launches no kernel and
    moves no bytes.  The identity kernel is kept behind a debug flag only as a
    smoke test of the Pallas data path; its result is intentionally discarded.
    """
    # TODO(synk): the original forward has no compute at all; nothing to lower.
    if debug_run_kernel:
        _pallas_identity(x)   # discarded, matching `forward: pass`
    return None


if __name__ == "__main__":
    key = jax.random.PRNGKey(0)
    k_small, k_big = jax.random.split(key)

    # Small NCHW input consistent with a GAN-style image module.
    x_small = jax.random.normal(k_small, (2, 4, 16, 16), dtype=jnp.float32)

    # Smoke-test the small (full-block, lane-dense) identity path.
    y_small = _pallas_identity(x_small)
    jax.block_until_ready(y_small)
    assert y_small.shape == x_small.shape
    assert jnp.array_equal(y_small, x_small)

    # Smoke-test the tiled / pipelined path on a modest activation-sized slab.
    x_big = jax.random.normal(k_big, (2, 4, 256, 256), dtype=jnp.float32)
    y_big = _pallas_identity(x_big)
    jax.block_until_ready(y_big)
    assert jnp.array_equal(y_big, x_big)

    # Module semantics: forward(x) is `pass` -> returns None, launches nothing.
    assert g_forward(x_small) is None
    assert g_forward(x_small, debug_run_kernel=True) is None

    print("KERNEL_OK")
</pallas_src>

<mosaic_0001>
module attributes {stable_mosaic.version = 11 : i64} {
  func.func @_identity_kernel(%arg0: memref<8x256xf32, #tpu.memory_space<vmem>>, %arg1: memref<8x256xf32, #tpu.memory_space<vmem>>) attributes {dimension_semantics = [], scalar_prefetch = 0 : i64, scratch_operands = 0 : i64, tpu.core_type = #tpu.core_type<tc>} {
    %c0 = arith.constant 0 : index
    %c0_0 = arith.constant 0 : index
    %0 = vector.load %arg0[%c0, %c0_0] : memref<8x256xf32, #tpu.memory_space<vmem>>, vector<8x256xf32>
    %c0_1 = arith.constant 0 : index
    %c0_2 = arith.constant 0 : index
    %1 = vector.load %arg1[%c0_1, %c0_2] : memref<8x256xf32, #tpu.memory_space<vmem>>, vector<8x256xf32>
    tpu.vector_store %arg1[%c0_1, %c0_2], %0 {strides = array<i32>} : memref<8x256xf32, #tpu.memory_space<vmem>>, vector<8x256xf32>,
    return
  }
}

</mosaic_0001>

<bundles_post_ra>
// kernel: tpu_custom_call.1
= control target key start
LH: loop header
LB: loop body
LE: loop exit
PB: predicated region body
PF: predicated region fallthrough
CT: control target
= control target key end

     0   :  { %6 = vsyncpa [#allocation3], 0  ;;  %s126_s0 = inlined_call_operand.hbm [shape: f32[8,256], index: 0, kind: input, shape index: {}, may-alias: {0,1}]   ;;  %s127_s1 = inlined_call_operand.hbm [shape: f32[8,256], index: 1, kind: output, shape index: {}, may-alias: {0,1}]  }
   0x1   :  { %7 = vsyncpa [#allocation4], 0  ;;  %s90_s6 = smov [#allocation2]   ;;  %s42_s10 = scalar_lea.hbm %s126_s0, 256 }
   0x2   :  { %s14_s7 = sshll.u32 %s90_s6, 4  ;;  %p43_p0 = scmp.ne.s32.totalorder %s126_s0, %s42_s10  ;;  %s15_s7 = int_to_ptr.vmem [resolvable:$true] %s14_s7 }
   0x3   :  { %p46_p1 = scmp.lt.u32.totalorder %s42_s10, %s126_s0 }
   0x5   :  { %p48_p2 = pnand %p46_p1, %p43_p0 }
   0x7   :  { %51 = shalt.err (!%p48_p2)
}
   0x8   :  { %s52_s15 = scalar_lea.vmem %s15_s7, 256  ;;  %p57_p4 = scmp.lt.s32.totalorder %s15_s7, %s15_s7 }
   0x9   :  { %p53_p3 = scmp.ne.s32.totalorder %s15_s7, %s52_s15  ;;  %p58_p5 = scmp.lt.s32.totalorder %s52_s15, %s52_s15 }
   0xb   :  { %p59_p6 = por %p58_p5, %p57_p4 }
   0xd   :  { %p60_p7 = pnand %p59_p6, %p53_p3 }
   0xf   :  { %63 = shalt.err (!%p60_p7)
}
  0x10   :  { %17 = dma.hbm_to_vmem [thread:$0]  %s126_s0, 256, %s15_s7, [#allocation3]  }
  0x11   :  { %86 = dma.done.wait [#allocation3], 256  }
  0x12   :  { %87 = vsyncadd [#allocation3], 4294967040  ;;  %s91_s18 = smov [#allocation5]   ;;  %v21_v0 = vld [vmem:[#allocation2] sm:$0xff]  ;;  %v22_v1 = vld [vmem:[#allocation2 + $0x8] sm:$0xff] }
  0x13   :  { %s31_s19 = sshll.u32 %s91_s18, 4  ;;  %23 = vst [vmem:[#allocation5] sm:$0xff] %v21_v0  ;;  %24 = vst [vmem:[#allocation5 + $0x8] sm:$0xff] %v22_v1  ;;  %s32_s19 = int_to_ptr.vmem [resolvable:$true] %s31_s19 }
  0x14   :  { %s64_s20 = scalar_lea.vmem %s32_s19, 256  ;;  %p69_p9 = scmp.lt.s32.totalorder %s32_s19, %s32_s19 }
  0x15   :  { %p65_p8 = scmp.ne.s32.totalorder %s32_s19, %s64_s20  ;;  %p70_p10 = scmp.lt.s32.totalorder %s64_s20, %s64_s20 }
  0x17   :  { %p71_p11 = por %p70_p10, %p69_p9 }
  0x19   :  { %p72_p12 = pnand %p71_p11, %p65_p8 }
  0x1b   :  { %75 = shalt.err (!%p72_p12)
}
  0x1c   :  { %s76_s0 = scalar_lea.hbm %s127_s1, 256 }
  0x1d   :  { %p77_p13 = scmp.ne.s32.totalorder %s127_s1, %s76_s0  ;;  %p80_p0 = scmp.lt.u32.totalorder %s76_s0, %s127_s1 }
  0x1f   :  { %p82_p1 = pnand %p80_p0, %p77_p13 }
  0x21   :  { %85 = shalt.err (!%p82_p1)
}
  0x22   :  { %34 = dma.vmem_to_hbm [thread:$0]  %s32_s19, 256, %s127_s1, [#allocation4]  }
  0x23   :  { %88 = dma.done.wait [#allocation4], 256  }
  0x24   :  { %89 = vsyncadd [#allocation4], 4294967040 }
  0x25   :  { %38 = vsyncpa [#allocation3], 1 }
  0x26   :  { %39 = vsyncpa [#allocation4], 1 }

</bundles_post_ra>
